<compile_context>
chip_gen: v7x
topology: tpu7x:2x2x1
jax: 0.10.0
libtpu: 0.0.40
codegen_flags: <defaults>
</compile_context>

<pallas_src>
import functools

import jax
import jax.numpy as jnp
from jax.experimental import pallas as pl
from jax.experimental.pallas import tpu as pltpu

LN_EPS = 1e-5
HIDDEN = 256
HEAD_HIDDEN = 128
OUT_PAD = 128   # lane-dense padded output width (action logits | value | zeros)
MIN_TILE = 16   # bf16-output sublane tiling (16, 128) safe; also f32-safe (8, 128)


def clip_policy_kernel(
    x_ref,
    fc1_w, fc1_b, ln1_w, ln1_b,
    fc2_w, fc2_b, ln2_w, ln2_b,
    h1_w, h1_b, h2_w, h2_b,
    out_ref,
):
    # Matmuls run in bf16 on the MXU with f32 accumulation; everything
    # element-wise (bias add, LayerNorm stats, ReLU) stays f32.
    x = x_ref[...].astype(jnp.bfloat16)

    def matmul(h_bf16, w_ref, b_ref):
        return (
            jnp.dot(h_bf16, w_ref[...], preferred_element_type=jnp.float32)
            + b_ref[...]
        )

    def layer_norm(h, g_ref, b_ref):
        mu = jnp.mean(h, axis=-1, keepdims=True)
        d = h - mu
        var = jnp.mean(d * d, axis=-1, keepdims=True)
        return d * jax.lax.rsqrt(var + LN_EPS) * g_ref[...] + b_ref[...]

    def relu_bf16(h):
        # ReLU fused with the bf16 cast so intermediate slabs materialize once
        # in bf16 (not f32 + a separate cast pass) — matters for v5e's 1 vst slot.
        return jnp.maximum(h, 0.0).astype(jnp.bfloat16)

    # feature_net: Linear -> LayerNorm -> ReLU -> Linear -> LayerNorm -> ReLU
    h = matmul(x, fc1_w, fc1_b)
    h = relu_bf16(layer_norm(h, ln1_w, ln1_b))
    h = matmul(h, fc2_w, fc2_b)
    feats = relu_bf16(layer_norm(h, ln2_w, ln2_b))

    # Fused heads: one full-width (B,256)x(256,256) matmul for both head-1
    # layers, ReLU, then one block-diagonal (B,256)x(256,128) matmul producing
    # [policy logits | value | zero padding] in a single lane-dense tile.
    hidden = relu_bf16(matmul(feats, h1_w, h1_b))
    z = matmul(hidden, h2_w, h2_b)  # (TILE_B, OUT_PAD) f32

    # tanh is applied in the wrapper on the sliced action lanes only;
    # kernel epilogue is a straight bf16 cast + store (lane-dense, unmasked).
    out_ref[...] = z.astype(out_ref.dtype)


def init_params(key, input_dim, action_dim, dtype=jnp.float32):
    """Deterministic synthetic parameter init (Linear weights stored as [in, out])."""
    keys = jax.random.split(key, 12)

    def lin(k, fan_in, fan_out):
        kw, kb = jax.random.split(k)
        bound = 1.0 / jnp.sqrt(fan_in)
        w = jax.random.uniform(kw, (fan_in, fan_out), dtype, -bound, bound)
        b = jax.random.uniform(kb, (1, fan_out), dtype, -bound, bound)
        return w, b

    params = {}
    params["fc1_w"], params["fc1_b"] = lin(keys[0], input_dim, HIDDEN)
    params["ln1_w"] = jnp.ones((1, HIDDEN), dtype)
    params["ln1_b"] = jnp.zeros((1, HIDDEN), dtype)
    params["fc2_w"], params["fc2_b"] = lin(keys[1], HIDDEN, HIDDEN)
    params["ln2_w"] = jnp.ones((1, HIDDEN), dtype)
    params["ln2_b"] = jnp.zeros((1, HIDDEN), dtype)
    params["p1_w"], params["p1_b"] = lin(keys[2], HIDDEN, HEAD_HIDDEN)
    params["p2_w"], params["p2_b"] = lin(keys[3], HEAD_HIDDEN, action_dim)
    params["v1_w"], params["v1_b"] = lin(keys[4], HIDDEN, HEAD_HIDDEN)
    params["v2_w"], params["v2_b"] = lin(keys[5], HEAD_HIDDEN, 1)
    return params


def _round_up(n, m):
    return ((n + m - 1) // m) * m


def fuse_params(params, action_dim):
    """Pre-fuse head weights and pre-cast matmul weights to bf16.

    Call ONCE at parameter-load time (hoisted out of the per-call forward so the
    ~12 small concat/at.set/astype XLA ops don't run every invocation).
    """
    # Block-diagonal head packing writes the value column at lane `action_dim`.
    assert action_dim + 1 <= OUT_PAD, (
        f"action_dim={action_dim} + value lane must fit in OUT_PAD={OUT_PAD}"
    )

    # Head layer 1: [p1 | v1] -> (256, 256)
    h1_w = jnp.concatenate([params["p1_w"], params["v1_w"]], axis=1)
    h1_b = jnp.concatenate([params["p1_b"], params["v1_b"]], axis=1)
    # Head layer 2: block-diagonal (256, OUT_PAD); lanes [0:action_dim] = policy,
    # lane action_dim = value, rest zero padding (lane-dense output).
    h2_w = jnp.zeros((2 * HEAD_HIDDEN, OUT_PAD), jnp.float32)
    h2_w = h2_w.at[:HEAD_HIDDEN, :action_dim].set(params["p2_w"])
    h2_w = h2_w.at[HEAD_HIDDEN:, action_dim].set(params["v2_w"][:, 0])
    h2_b = jnp.zeros((1, OUT_PAD), jnp.float32)
    h2_b = h2_b.at[0, :action_dim].set(params["p2_b"][0])
    h2_b = h2_b.at[0, action_dim].set(params["v2_b"][0, 0])

    bf = jnp.bfloat16
    weight_args = [
        params["fc1_w"].astype(bf), params["fc1_b"],
        params["ln1_w"], params["ln1_b"],
        params["fc2_w"].astype(bf), params["fc2_b"],
        params["ln2_w"], params["ln2_b"],
        h1_w.astype(bf), h1_b,
        h2_w.astype(bf), h2_b,
    ]
    # Materialize once so eager callers don't retrace/recompute the fusion.
    return jax.block_until_ready([jnp.asarray(w) for w in weight_args])


def _select_tile(batch, tile_b):
    """Pick a batch tile: big enough to amortize per-grid-step overhead, small
    enough that the grid has >= 2 steps (v7x megacore) when the batch allows."""
    b_min = _round_up(batch, MIN_TILE)
    tile = min(tile_b, b_min)
    if b_min >= 2 * MIN_TILE:
        # Guarantee at least 2 grid steps so ("parallel",) shards across both
        # v7x TensorCores instead of leaving one idle.
        tile = min(tile, _round_up(pl.cdiv(b_min, 2), MIN_TILE))
    tile = max(tile, MIN_TILE)
    b_pad = _round_up(b_min, tile)
    return tile, b_pad


def _vmem_limit_bytes(tile_b, input_dim):
    est = (
        2 * tile_b * input_dim * 4      # input double buffer (f32)
        + 2 * tile_b * OUT_PAD * 2      # output double buffer (bf16)
        + 10 * tile_b * HIDDEN * 4      # activation slabs (generous f32 bound)
        + 4 * 1024 * 1024               # resident weights + misc scratch
    )
    # Headroom, capped below v7x's 64 MiB/TC physical VMEM.
    return int(min(est * 1.25, 56 * 1024 * 1024))


def clip_policy_forward(x, fused_weights, action_dim, *, tile_b=2048):
    """Forward pass. `fused_weights` comes from fuse_params() (called once)."""
    B, input_dim = x.shape
    tile, b_pad = _select_tile(B, tile_b)
    if b_pad != B:
        x = jnp.pad(x, ((0, b_pad - B), (0, 0)))

    in_specs = [pl.BlockSpec((tile, input_dim), lambda i: (i, 0))] + [
        # full-array blocks with constant index_map: weights stay VMEM-resident,
        # no per-step re-DMA.
        pl.BlockSpec(w.shape, lambda i: (0, 0))
        for w in fused_weights
    ]
    out_specs = pl.BlockSpec((tile, OUT_PAD), lambda i: (i, 0))
    # bf16 output halves the dominant HBM writeback stream (v6e/v7x roofline).
    out_shape = jax.ShapeDtypeStruct((b_pad, OUT_PAD), jnp.bfloat16)

    flops = 2 * b_pad * (
        input_dim * HIDDEN + HIDDEN * HIDDEN + HIDDEN * HIDDEN + HIDDEN * OUT_PAD
    )
    transcendentals = b_pad * 2  # 2 LayerNorm rsqrt per row (tanh moved to wrapper)
    bytes_accessed = (
        b_pad * input_dim * x.dtype.itemsize
        + sum(int(w.size) * w.dtype.itemsize for w in fused_weights)
        + b_pad * OUT_PAD * 2
    )

    out = pl.pallas_call(
        clip_policy_kernel,
        out_shape=out_shape,
        grid=(b_pad // tile,),
        in_specs=in_specs,
        out_specs=out_specs,
        compiler_params=pltpu.CompilerParams(
            dimension_semantics=("parallel",),
            vmem_limit_bytes=_vmem_limit_bytes(tile, input_dim),
        ),
        cost_estimate=pl.CostEstimate(
            flops=flops,
            transcendentals=transcendentals,
            bytes_accessed=bytes_accessed,
        ),
    )(x, *fused_weights)

    # tanh only over the action_dim lanes actually needed; XLA fuses it with
    # the slice.  Outputs returned in f32 (value lane is a plain cast).
    action = jnp.tanh(out[:B, :action_dim].astype(jnp.float32))
    value = out[:B, action_dim:action_dim + 1].astype(jnp.float32)
    return action, value


def reference_forward(x, params):
    """Pure f32 JAX reference matching the PyTorch module."""
    def ln(h, g, b):
        mu = jnp.mean(h, axis=-1, keepdims=True)
        var = jnp.mean((h - mu) ** 2, axis=-1, keepdims=True)
        return (h - mu) / jnp.sqrt(var + LN_EPS) * g + b

    h = x @ params["fc1_w"] + params["fc1_b"]
    h = jnp.maximum(ln(h, params["ln1_w"], params["ln1_b"]), 0.0)
    h = h @ params["fc2_w"] + params["fc2_b"]
    feats = jnp.maximum(ln(h, params["ln2_w"], params["ln2_b"]), 0.0)
    p = jnp.maximum(feats @ params["p1_w"] + params["p1_b"], 0.0)
    action = jnp.tanh(p @ params["p2_w"] + params["p2_b"])
    v = jnp.maximum(feats @ params["v1_w"] + params["v1_b"], 0.0)
    value = v @ params["v2_w"] + params["v2_b"]
    return action, value


if __name__ == "__main__":
    import numpy as np

    batch, input_dim, action_dim = 8, 32, 4
    key = jax.random.PRNGKey(0)
    kx, kp = jax.random.split(key)
    x = jax.random.normal(kx, (batch, input_dim), jnp.float32)
    params = init_params(kp, input_dim, action_dim)

    # Head fusion / bf16 weight cast done ONCE, outside the forward.
    fused_weights = fuse_params(params, action_dim)

    action_mean, value = clip_policy_forward(x, fused_weights, action_dim)
    jax.block_until_ready((action_mean, value))

    ref_action, ref_value = reference_forward(x, params)
    # bf16 matmul inputs + bf16 output (f32 MXU accumulation / f32 LN stats):
    # loosened tolerances vs the pure-f32 reference, documented & intentional.
    np.testing.assert_allclose(np.asarray(action_mean), np.asarray(ref_action),
                               rtol=3e-2, atol=3e-2)
    np.testing.assert_allclose(np.asarray(value), np.asarray(ref_value),
                               rtol=3e-2, atol=3e-2)

    assert action_mean.shape == (batch, action_dim)
    assert value.shape == (batch, 1)
    print("KERNEL_OK")
</pallas_src>

<mosaic_0001>
module attributes {stable_mosaic.version = 11 : i64} {
  func.func @clip_policy_kernel(%arg0: i32, %arg1: memref<16x32xf32, #tpu.memory_space<vmem>>, %arg2: memref<32x256xbf16, #tpu.memory_space<vmem>>, %arg3: memref<1x256xf32, #tpu.memory_space<vmem>>, %arg4: memref<1x256xf32, #tpu.memory_space<vmem>>, %arg5: memref<1x256xf32, #tpu.memory_space<vmem>>, %arg6: memref<256x256xbf16, #tpu.memory_space<vmem>>, %arg7: memref<1x256xf32, #tpu.memory_space<vmem>>, %arg8: memref<1x256xf32, #tpu.memory_space<vmem>>, %arg9: memref<1x256xf32, #tpu.memory_space<vmem>>, %arg10: memref<256x256xbf16, #tpu.memory_space<vmem>>, %arg11: memref<1x256xf32, #tpu.memory_space<vmem>>, %arg12: memref<256x128xbf16, #tpu.memory_space<vmem>>, %arg13: memref<1x128xf32, #tpu.memory_space<vmem>>, %arg14: memref<16x128xbf16, #tpu.memory_space<vmem>>) attributes {dimension_semantics = [#tpu.dimension_semantics<parallel>], iteration_bounds = array<i64: 1>, scalar_prefetch = 0 : i64, scratch_operands = 0 : i64, tpu.core_type = #tpu.core_type<tc>, window_params = [{transform_indices = @transform_0, window_bounds = array<i64: 16, 32>}, {pipeline_mode = #tpu.pipeline_mode<synchronous>, transform_indices = @transform_1, window_bounds = array<i64: 32, 256>}, {pipeline_mode = #tpu.pipeline_mode<synchronous>, transform_indices = @transform_2, window_bounds = array<i64: 1, 256>}, {pipeline_mode = #tpu.pipeline_mode<synchronous>, transform_indices = @transform_3, window_bounds = array<i64: 1, 256>}, {pipeline_mode = #tpu.pipeline_mode<synchronous>, transform_indices = @transform_4, window_bounds = array<i64: 1, 256>}, {pipeline_mode = #tpu.pipeline_mode<synchronous>, transform_indices = @transform_5, window_bounds = array<i64: 256, 256>}, {pipeline_mode = #tpu.pipeline_mode<synchronous>, transform_indices = @transform_6, window_bounds = array<i64: 1, 256>}, {pipeline_mode = #tpu.pipeline_mode<synchronous>, transform_indices = @transform_7, window_bounds = array<i64: 1, 256>}, {pipeline_mode = #tpu.pipeline_mode<synchronous>, transform_indices = @transform_8, window_bounds = array<i64: 1, 256>}, {pipeline_mode = #tpu.pipeline_mode<synchronous>, transform_indices = @transform_9, window_bounds = array<i64: 256, 256>}, {pipeline_mode = #tpu.pipeline_mode<synchronous>, transform_indices = @transform_10, window_bounds = array<i64: 1, 256>}, {pipeline_mode = #tpu.pipeline_mode<synchronous>, transform_indices = @transform_11, window_bounds = array<i64: 256, 128>}, {pipeline_mode = #tpu.pipeline_mode<synchronous>, transform_indices = @transform_12, window_bounds = array<i64: 1, 128>}, {transform_indices = @transform_13, window_bounds = array<i64: 16, 128>}]} {
    %c0 = arith.constant 0 : index
    %c0_0 = arith.constant 0 : index
    %0 = vector.load %arg1[%c0, %c0_0] : memref<16x32xf32, #tpu.memory_space<vmem>>, vector<16x32xf32>
    %1 = arith.truncf %0 : vector<16x32xf32> to vector<16x32xbf16>
    %c0_1 = arith.constant 0 : index
    %c0_2 = arith.constant 0 : index
    %2 = vector.load %arg2[%c0_1, %c0_2] : memref<32x256xbf16, #tpu.memory_space<vmem>>, vector<32x256xbf16>
    %cst = arith.constant dense<0.000000e+00> : vector<16x256xf32>
    %3 = tpu.matmul %1, %2, %cst {dimension_numbers = #tpu.dot_dimension_numbers<[1], [0], [0], [1], [0, 0, 1, 1], [], []>} : vector<16x32xbf16>, vector<32x256xbf16>, vector<16x256xf32> -> vector<16x256xf32>
    %c0_3 = arith.constant 0 : index
    %c0_4 = arith.constant 0 : index
    %4 = vector.load %arg3[%c0_3, %c0_4] : memref<1x256xf32, #tpu.memory_space<vmem>>, vector<1x256xf32>
    %5 = vector.broadcast %4 : vector<1x256xf32> to vector<16x256xf32>
    %6 = arith.addf %3, %5 : vector<16x256xf32>
    %cst_5 = arith.constant dense<0.000000e+00> : vector<16xf32>
    %7 = vector.multi_reduction <add>, %6, %cst_5 [1] : vector<16x256xf32> to vector<16xf32>
    %8 = vector.shape_cast %7 : vector<16xf32> to vector<16x1xf32>
    %cst_6 = arith.constant 2.560000e+02 : f32
    %9 = vector.broadcast %cst_6 : f32 to vector<16x1xf32>
    %10 = arith.divf %8, %9 : vector<16x1xf32>
    %11 = vector.broadcast %10 : vector<16x1xf32> to vector<16x256xf32>
    %12 = arith.subf %6, %11 : vector<16x256xf32>
    %13 = arith.mulf %12, %12 : vector<16x256xf32>
    %cst_7 = arith.constant dense<0.000000e+00> : vector<16xf32>
    %14 = vector.multi_reduction <add>, %13, %cst_7 [1] : vector<16x256xf32> to vector<16xf32>
    %15 = vector.shape_cast %14 : vector<16xf32> to vector<16x1xf32>
    %cst_8 = arith.constant 2.560000e+02 : f32
    %16 = vector.broadcast %cst_8 : f32 to vector<16x1xf32>
    %17 = arith.divf %15, %16 : vector<16x1xf32>
    %cst_9 = arith.constant 9.99999974E-6 : f32
    %18 = vector.broadcast %cst_9 : f32 to vector<16x1xf32>
    %19 = arith.addf %17, %18 : vector<16x1xf32>
    %20 = math.rsqrt %19 : vector<16x1xf32>
    %21 = vector.broadcast %20 : vector<16x1xf32> to vector<16x256xf32>
    %22 = arith.mulf %12, %21 : vector<16x256xf32>
    %c0_10 = arith.constant 0 : index
    %c0_11 = arith.constant 0 : index
    %23 = vector.load %arg4[%c0_10, %c0_11] : memref<1x256xf32, #tpu.memory_space<vmem>>, vector<1x256xf32>
    %24 = vector.broadcast %23 : vector<1x256xf32> to vector<16x256xf32>
    %25 = arith.mulf %22, %24 : vector<16x256xf32>
    %c0_12 = arith.constant 0 : index
    %c0_13 = arith.constant 0 : index
    %26 = vector.load %arg5[%c0_12, %c0_13] : memref<1x256xf32, #tpu.memory_space<vmem>>, vector<1x256xf32>
    %27 = vector.broadcast %26 : vector<1x256xf32> to vector<16x256xf32>
    %28 = arith.addf %25, %27 : vector<16x256xf32>
    %cst_14 = arith.constant 0.000000e+00 : f32
    %29 = vector.broadcast %cst_14 : f32 to vector<16x256xf32>
    %30 = arith.maximumf %28, %29 : vector<16x256xf32>
    %31 = arith.truncf %30 : vector<16x256xf32> to vector<16x256xbf16>
    %c0_15 = arith.constant 0 : index
    %c0_16 = arith.constant 0 : index
    %32 = vector.load %arg6[%c0_15, %c0_16] : memref<256x256xbf16, #tpu.memory_space<vmem>>, vector<256x256xbf16>
    %cst_17 = arith.constant dense<0.000000e+00> : vector<16x256xf32>
    %33 = tpu.matmul %31, %32, %cst_17 {dimension_numbers = #tpu.dot_dimension_numbers<[1], [0], [0], [1], [0, 0, 1, 1], [], []>} : vector<16x256xbf16>, vector<256x256xbf16>, vector<16x256xf32> -> vector<16x256xf32>
    %c0_18 = arith.constant 0 : index
    %c0_19 = arith.constant 0 : index
    %34 = vector.load %arg7[%c0_18, %c0_19] : memref<1x256xf32, #tpu.memory_space<vmem>>, vector<1x256xf32>
    %35 = vector.broadcast %34 : vector<1x256xf32> to vector<16x256xf32>
    %36 = arith.addf %33, %35 : vector<16x256xf32>
    %cst_20 = arith.constant dense<0.000000e+00> : vector<16xf32>
    %37 = vector.multi_reduction <add>, %36, %cst_20 [1] : vector<16x256xf32> to vector<16xf32>
    %38 = vector.shape_cast %37 : vector<16xf32> to vector<16x1xf32>
    %cst_21 = arith.constant 2.560000e+02 : f32
    %39 = vector.broadcast %cst_21 : f32 to vector<16x1xf32>
    %40 = arith.divf %38, %39 : vector<16x1xf32>
    %41 = vector.broadcast %40 : vector<16x1xf32> to vector<16x256xf32>
    %42 = arith.subf %36, %41 : vector<16x256xf32>
    %43 = arith.mulf %42, %42 : vector<16x256xf32>
    %cst_22 = arith.constant dense<0.000000e+00> : vector<16xf32>
    %44 = vector.multi_reduction <add>, %43, %cst_22 [1] : vector<16x256xf32> to vector<16xf32>
    %45 = vector.shape_cast %44 : vector<16xf32> to vector<16x1xf32>
    %cst_23 = arith.constant 2.560000e+02 : f32
    %46 = vector.broadcast %cst_23 : f32 to vector<16x1xf32>
    %47 = arith.divf %45, %46 : vector<16x1xf32>
    %cst_24 = arith.constant 9.99999974E-6 : f32
    %48 = vector.broadcast %cst_24 : f32 to vector<16x1xf32>
    %49 = arith.addf %47, %48 : vector<16x1xf32>
    %50 = math.rsqrt %49 : vector<16x1xf32>
    %51 = vector.broadcast %50 : vector<16x1xf32> to vector<16x256xf32>
    %52 = arith.mulf %42, %51 : vector<16x256xf32>
    %c0_25 = arith.constant 0 : index
    %c0_26 = arith.constant 0 : index
    %53 = vector.load %arg8[%c0_25, %c0_26] : memref<1x256xf32, #tpu.memory_space<vmem>>, vector<1x256xf32>
    %54 = vector.broadcast %53 : vector<1x256xf32> to vector<16x256xf32>
    %55 = arith.mulf %52, %54 : vector<16x256xf32>
    %c0_27 = arith.constant 0 : index
    %c0_28 = arith.constant 0 : index
    %56 = vector.load %arg9[%c0_27, %c0_28] : memref<1x256xf32, #tpu.memory_space<vmem>>, vector<1x256xf32>
    %57 = vector.broadcast %56 : vector<1x256xf32> to vector<16x256xf32>
    %58 = arith.addf %55, %57 : vector<16x256xf32>
    %cst_29 = arith.constant 0.000000e+00 : f32
    %59 = vector.broadcast %cst_29 : f32 to vector<16x256xf32>
    %60 = arith.maximumf %58, %59 : vector<16x256xf32>
    %61 = arith.truncf %60 : vector<16x256xf32> to vector<16x256xbf16>
    %c0_30 = arith.constant 0 : index
    %c0_31 = arith.constant 0 : index
    %62 = vector.load %arg10[%c0_30, %c0_31] : memref<256x256xbf16, #tpu.memory_space<vmem>>, vector<256x256xbf16>
    %cst_32 = arith.constant dense<0.000000e+00> : vector<16x256xf32>
    %63 = tpu.matmul %61, %62, %cst_32 {dimension_numbers = #tpu.dot_dimension_numbers<[1], [0], [0], [1], [0, 0, 1, 1], [], []>} : vector<16x256xbf16>, vector<256x256xbf16>, vector<16x256xf32> -> vector<16x256xf32>
    %c0_33 = arith.constant 0 : index
    %c0_34 = arith.constant 0 : index
    %64 = vector.load %arg11[%c0_33, %c0_34] : memref<1x256xf32, #tpu.memory_space<vmem>>, vector<1x256xf32>
    %65 = vector.broadcast %64 : vector<1x256xf32> to vector<16x256xf32>
    %66 = arith.addf %63, %65 : vector<16x256xf32>
    %cst_35 = arith.constant 0.000000e+00 : f32
    %67 = vector.broadcast %cst_35 : f32 to vector<16x256xf32>
    %68 = arith.maximumf %66, %67 : vector<16x256xf32>
    %69 = arith.truncf %68 : vector<16x256xf32> to vector<16x256xbf16>
    %c0_36 = arith.constant 0 : index
    %c0_37 = arith.constant 0 : index
    %70 = vector.load %arg12[%c0_36, %c0_37] : memref<256x128xbf16, #tpu.memory_space<vmem>>, vector<256x128xbf16>
    %cst_38 = arith.constant dense<0.000000e+00> : vector<16x128xf32>
    %71 = tpu.matmul %69, %70, %cst_38 {dimension_numbers = #tpu.dot_dimension_numbers<[1], [0], [0], [1], [0, 0, 1, 1], [], []>} : vector<16x256xbf16>, vector<256x128xbf16>, vector<16x128xf32> -> vector<16x128xf32>
    %c0_39 = arith.constant 0 : index
    %c0_40 = arith.constant 0 : index
    %72 = vector.load %arg13[%c0_39, %c0_40] : memref<1x128xf32, #tpu.memory_space<vmem>>, vector<1x128xf32>
    %73 = vector.broadcast %72 : vector<1x128xf32> to vector<16x128xf32>
    %74 = arith.addf %71, %73 : vector<16x128xf32>
    %75 = arith.truncf %74 : vector<16x128xf32> to vector<16x128xbf16>
    %c0_41 = arith.constant 0 : index
    %c0_42 = arith.constant 0 : index
    %76 = vector.load %arg14[%c0_41, %c0_42] : memref<16x128xbf16, #tpu.memory_space<vmem>>, vector<16x128xbf16>
    tpu.vector_store %arg14[%c0_41, %c0_42], %75 {strides = array<i32>} : memref<16x128xbf16, #tpu.memory_space<vmem>>, vector<16x128xbf16>,
    return
  }
  func.func @transform_0(%arg0: i32) -> (i32, i32) {
    %c0_i32 = arith.constant 0 : i32
    %c0_i32_0 = arith.constant 0 : i32
    return %arg0, %c0_i32 : i32, i32
  }
  func.func @transform_1(%arg0: i32) -> (i32, i32) {
    %c0_i32 = arith.constant 0 : i32
    %c0_i32_0 = arith.constant 0 : i32
    %c0_i32_1 = arith.constant 0 : i32
    return %c0_i32, %c0_i32_0 : i32, i32
  }
  func.func @transform_2(%arg0: i32) -> (i32, i32) {
    %c0_i32 = arith.constant 0 : i32
    %c0_i32_0 = arith.constant 0 : i32
    %c0_i32_1 = arith.constant 0 : i32
    return %c0_i32, %c0_i32_0 : i32, i32
  }
  func.func @transform_3(%arg0: i32) -> (i32, i32) {
    %c0_i32 = arith.constant 0 : i32
    %c0_i32_0 = arith.constant 0 : i32
    %c0_i32_1 = arith.constant 0 : i32
    return %c0_i32, %c0_i32_0 : i32, i32
  }
  func.func @transform_4(%arg0: i32) -> (i32, i32) {
    %c0_i32 = arith.constant 0 : i32
    %c0_i32_0 = arith.constant 0 : i32
    %c0_i32_1 = arith.constant 0 : i32
    return %c0_i32, %c0_i32_0 : i32, i32
  }
  func.func @transform_5(%arg0: i32) -> (i32, i32) {
    %c0_i32 = arith.constant 0 : i32
    %c0_i32_0 = arith.constant 0 : i32
    %c0_i32_1 = arith.constant 0 : i32
    return %c0_i32, %c0_i32_0 : i32, i32
  }
  func.func @transform_6(%arg0: i32) -> (i32, i32) {
    %c0_i32 = arith.constant 0 : i32
    %c0_i32_0 = arith.constant 0 : i32
    %c0_i32_1 = arith.constant 0 : i32
    return %c0_i32, %c0_i32_0 : i32, i32
  }
  func.func @transform_7(%arg0: i32) -> (i32, i32) {
    %c0_i32 = arith.constant 0 : i32
    %c0_i32_0 = arith.constant 0 : i32
    %c0_i32_1 = arith.constant 0 : i32
    return %c0_i32, %c0_i32_0 : i32, i32
  }
  func.func @transform_8(%arg0: i32) -> (i32, i32) {
    %c0_i32 = arith.constant 0 : i32
    %c0_i32_0 = arith.constant 0 : i32
    %c0_i32_1 = arith.constant 0 : i32
    return %c0_i32, %c0_i32_0 : i32, i32
  }
  func.func @transform_9(%arg0: i32) -> (i32, i32) {
    %c0_i32 = arith.constant 0 : i32
    %c0_i32_0 = arith.constant 0 : i32
    %c0_i32_1 = arith.constant 0 : i32
    return %c0_i32, %c0_i32_0 : i32, i32
  }
  func.func @transform_10(%arg0: i32) -> (i32, i32) {
    %c0_i32 = arith.constant 0 : i32
    %c0_i32_0 = arith.constant 0 : i32
    %c0_i32_1 = arith.constant 0 : i32
    return %c0_i32, %c0_i32_0 : i32, i32
  }
  func.func @transform_11(%arg0: i32) -> (i32, i32) {
    %c0_i32 = arith.constant 0 : i32
    %c0_i32_0 = arith.constant 0 : i32
    %c0_i32_1 = arith.constant 0 : i32
    return %c0_i32, %c0_i32_0 : i32, i32
  }
  func.func @transform_12(%arg0: i32) -> (i32, i32) {
    %c0_i32 = arith.constant 0 : i32
    %c0_i32_0 = arith.constant 0 : i32
    %c0_i32_1 = arith.constant 0 : i32
    return %c0_i32, %c0_i32_0 : i32, i32
  }
  func.func @transform_13(%arg0: i32) -> (i32, i32) {
    %c0_i32 = arith.constant 0 : i32
    %c0_i32_0 = arith.constant 0 : i32
    return %arg0, %c0_i32 : i32, i32
  }
}

</mosaic_0001>

<bundles_post_ra>
// kernel: tpu_custom_call.1
= control target key start
LH: loop header
LB: loop body
LE: loop exit
PB: predicated region body
PF: predicated region fallthrough
CT: control target
= control target key end

     0   :  { %18 = vsyncpa [#allocation3], 0  ;;  %s1687_s0 = inlined_call_operand.hbm [shape: f32[16,32], index: 0, kind: input, shape index: {}]   ;;  %s1688_s1 = inlined_call_operand.hbm [shape: bf16[32,256], index: 1, kind: input, shape index: {}]   ;;  %s1689_s2 = inlined_call_operand.vmem [shape: f32[1,256], index: 2, kind: input, shape index: {}]   ;;  %s1690_s3 = inlined_call_operand.vmem [shape: f32[1,256], index: 3, kind: input, shape index: {}]   ;;  %s1691_s4 = inlined_call_operand.vmem [shape: f32[1,256], index: 4, kind: input, shape index: {}]   ;;  %s1692_s5 = inlined_call_operand.hbm [shape: bf16[256,256], index: 5, kind: input, shape index: {}]   ;;  %s1693_s6 = inlined_call_operand.vmem [shape: f32[1,256], index: 6, kind: input, shape index: {}]   ;;  %s1694_s7 = inlined_call_operand.vmem [shape: f32[1,256], index: 7, kind: input, shape index: {}]   ;;  %s1695_s8 = inlined_call_operand.vmem [shape: f32[1,256], index: 8, kind: input, shape index: {}]   ;;  %s1696_s9 = inlined_call_operand.hbm [shape: bf16[256,256], index: 9, kind: input, shape index: {}]   ;;  %s1697_s10 = inlined_call_operand.vmem [shape: f32[1,256], index: 10, kind: input, shape index: {}]   ;;  %s1698_s11 = inlined_call_operand.hbm [shape: bf16[256,128], index: 11, kind: input, shape index: {}]   ;;  %s1699_s12 = inlined_call_operand.vmem [shape: f32[1,128], index: 12, kind: input, shape index: {}]   ;;  %s1700_s13 = inlined_call_operand.hbm [shape: bf16[16,128], index: 13, kind: output, shape index: {}]  }
   0x1   :  { %19 = vsyncpa [#allocation6], 0 }
   0x2   :  { %20 = vsyncpa [#allocation9], 0 }
   0x3   :  { %21 = vsyncpa [#allocation4], 0  ;;  %s1440_s25 = smov [#allocation5]   ;;  %s1441_s27 = smov [#allocation8]  }
   0x4   :  { %s39_s26 = sshll.u32 %s1440_s25, 4  ;;  %s75_s28 = sshll.u32 %s1441_s27, 4  ;;  %s40_s26 = int_to_ptr.vmem [resolvable:$true] %s39_s26  ;;  %s1521_s28 = int_to_ptr.vmem [resolvable:$true] %s75_s28 }
   0x5   :  { %s1300_s14 = scalar_lea.hbm %s1688_s1, 512 }
   0x6   :  { %p1301_p0 = scmp.ne.s32.totalorder %s1688_s1, %s1300_s14  ;;  %p1304_p1 = scmp.lt.u32.totalorder %s1300_s14, %s1688_s1 }
   0x8   :  { %p1306_p2 = pnand %p1304_p1, %p1301_p0 }
   0xa   :  { %1309 = shalt.err (!%p1306_p2)
}
   0xb   :  { %s1310_s19 = scalar_lea.vmem %s40_s26, 512  ;;  %p1315_p4 = scmp.lt.s32.totalorder %s40_s26, %s40_s26 }
   0xc   :  { %p1311_p3 = scmp.ne.s32.totalorder %s40_s26, %s1310_s19  ;;  %p1316_p5 = scmp.lt.s32.totalorder %s1310_s19, %s1310_s19 }
   0xe   :  { %p1317_p6 = por %p1316_p5, %p1315_p4 }
  0x10   :  { %p1318_p7 = pnand %p1317_p6, %p1311_p3 }
  0x12   :  { %1321 = shalt.err (!%p1318_p7)
}
  0x13   :  { %s1442_s20 = smov 128   ;;  %s1443_s21 = smov 8  }
  0x14   :  { %45 = dma.hbm_to_vmem [thread:$0]  %s1688_s1, 512, %s40_s26, [#allocation6], %s1442_s20, %s1442_s20, %s1443_s21  }
  0x15   :  { %s1322_s27 = scalar_lea.hbm %s1696_s9, 4096 }
  0x16   :  { %p1323_p8 = scmp.ne.s32.totalorder %s1696_s9, %s1322_s27  ;;  %p1326_p9 = scmp.lt.u32.totalorder %s1322_s27, %s1696_s9 }
  0x18   :  { %p1328_p10 = pnand %p1326_p9, %p1323_p8 }
  0x1a   :  { %1331 = shalt.err (!%p1328_p10)
}
  0x1b   :  { %s1332_s16 = scalar_lea.vmem %s1521_s28, 4096  ;;  %p1337_p12 = scmp.lt.s32.totalorder %s1521_s28, %s1521_s28 }
  0x1c   :  { %p1333_p11 = scmp.ne.s32.totalorder %s1521_s28, %s1332_s16  ;;  %p1338_p13 = scmp.lt.s32.totalorder %s1332_s16, %s1332_s16 }
  0x1e   :  { %p1339_p0 = por %p1338_p13, %p1337_p12 }
  0x20   :  { %p1340_p1 = pnand %p1339_p0, %p1333_p11 }
  0x22   :  { %1343 = shalt.err (!%p1340_p1)
}
  0x23   :  { %81 = dma.hbm_to_vmem [thread:$0]  %s1696_s9, 4096, %s1521_s28, [#allocation9], %s1442_s20, %s1442_s20, %s1443_s21  }
  0x24   :  { %s1444_s17 = smov [#allocation2]   ;;  %s1445_s19 = smov [#allocation7]  }
  0x25   :  { %s27_s18 = sshll.u32 %s1444_s17, 4  ;;  %s57_s22 = sshll.u32 %s1445_s19, 4  ;;  %s28_s18 = int_to_ptr.vmem [resolvable:$true] %s27_s18  ;;  %s1558_s22 = int_to_ptr.vmem [resolvable:$true] %s57_s22 }
  0x26   :  { %s1344_s25 = scalar_lea.hbm %s1687_s0, 256 }
  0x27   :  { %p1345_p2 = scmp.ne.s32.totalorder %s1687_s0, %s1344_s25  ;;  %p1348_p3 = scmp.lt.u32.totalorder %s1344_s25, %s1687_s0 }
  0x29   :  { %p1350_p4 = pnand %p1348_p3, %p1345_p2 }
  0x2b   :  { %1353 = shalt.err (!%p1350_p4)
}
  0x2c   :  { %s1354_s9 = scalar_lea.vmem %s28_s18, 256  ;;  %p1359_p6 = scmp.lt.s32.totalorder %s28_s18, %s28_s18 }
  0x2d   :  { %p1355_p5 = scmp.ne.s32.totalorder %s28_s18, %s1354_s9  ;;  %p1360_p7 = scmp.lt.s32.totalorder %s1354_s9, %s1354_s9 }
  0x2f   :  { %p1361_p8 = por %p1360_p7, %p1359_p6 }
  0x31   :  { %p1362_p9 = pnand %p1361_p8, %p1355_p5 }
  0x33   :  { %1365 = shalt.err (!%p1362_p9)
}
  0x34   :  { %33 = dma.hbm_to_vmem [thread:$0]  %s1687_s0, 256, %s28_s18, [#allocation3], %s1442_s20, %s1442_s20, %s1443_s21  }
  0x35   :  { %s1366_s26 = scalar_lea.hbm %s1692_s5, 4096 }
  0x36   :  { %p1367_p10 = scmp.ne.s32.totalorder %s1692_s5, %s1366_s26  ;;  %p1370_p11 = scmp.lt.u32.totalorder %s1366_s26, %s1692_s5 }
  0x38   :  { %p1372_p12 = pnand %p1370_p11, %p1367_p10 }
  0x3a   :  { %1375 = shalt.err (!%p1372_p12)
}
  0x3b   :  { %s1376_s25 = scalar_lea.vmem %s1558_s22, 4096  ;;  %p1381_p0 = scmp.lt.s32.totalorder %s1558_s22, %s1558_s22 }
  0x3c   :  { %p1377_p13 = scmp.ne.s32.totalorder %s1558_s22, %s1376_s25  ;;  %p1382_p1 = scmp.lt.s32.totalorder %s1376_s25, %s1376_s25 }
  0x3e   :  { %p1383_p2 = por %p1382_p1, %p1381_p0 }
  0x40   :  { %p1384_p3 = pnand %p1383_p2, %p1377_p13 }
  0x42   :  { %1387 = shalt.err (!%p1384_p3)
}
  0x43   :  { %63 = dma.hbm_to_vmem [thread:$0]  %s1692_s5, 4096, %s1558_s22, [#allocation6], %s1442_s20, %s1442_s20, %s1443_s21  }
  0x44   :  { %s1446_s27 = smov [#allocation10]   ;;  %s1388_s9 = scalar_lea.hbm %s1698_s11, 2048 }
  0x45   :  { %s89_s29 = sshll.u32 %s1446_s27, 4  ;;  %p1389_p4 = scmp.ne.s32.totalorder %s1698_s11, %s1388_s9  ;;  %s90_s29 = int_to_ptr.vmem [resolvable:$true] %s89_s29 }
  0x46   :  { %p1392_p5 = scmp.lt.u32.totalorder %s1388_s9, %s1698_s11 }
  0x48   :  { %p1394_p6 = pnand %p1392_p5, %p1389_p4 }
  0x4a   :  { %1397 = shalt.err (!%p1394_p6)
}
  0x4b   :  { %s1398_s26 = scalar_lea.vmem %s90_s29, 2048  ;;  %p1403_p8 = scmp.lt.s32.totalorder %s90_s29, %s90_s29 }
  0x4c   :  { %p1399_p7 = scmp.ne.s32.totalorder %s90_s29, %s1398_s26  ;;  %p1404_p9 = scmp.lt.s32.totalorder %s1398_s26, %s1398_s26 }
  0x4e   :  { %p1405_p10 = por %p1404_p9, %p1403_p8 }
  0x50   :  { %p1406_p11 = pnand %p1405_p10, %p1399_p7 }
  0x52   :  { %1409 = shalt.err (!%p1406_p11)
}
  0x53   :  { %s1447_s5 = smov 64   ;;  %s1448_s20 = smov 4  }
  0x54   :  { %95 = dma.hbm_to_vmem [thread:$0]  %s1698_s11, 2048, %s90_s29, [#allocation9], %s1447_s5, %s1447_s5, %s1448_s20  }
  0x55   :  { %1432 = dma.done.wait [#allocation3], 256  }
  0x56   :  { %1433 = vsyncadd [#allocation3], 4294967040 }
  0x57   :  { %1434 = dma.done.wait [#allocation6], 4608  }
  0x58   :  { %1435 = vsyncadd [#allocation6], 4294962688 }
  0x59   :  { %1436 = dma.done.wait [#allocation9], 6144  }
  0x5a   :  { %1437 = vsyncadd [#allocation9], 4294961152  ;;  %v1449_v0 = vmov 0   ;;  %v1174_v1 = vld [vmem:[#allocation5 + $0x4] ss:$8 sps:$4 sm:$0xff]   ;;  %v114_v5 = vld [vmem:[#allocation2] sm:$0xff]  ;;  %v123_v8 = vlaneseq }
  0x5b   :  { %189 = vmatprep.mubr.bf16.mxu0 %v1449_v0  ;;  %v1176_v2 = vld [vmem:[#allocation5] ss:$8 sps:$4 sm:$0xff]   ;;  %157 = vmatprep.subr.bf16.mxu0 %v1174_v1  ;;  %v1177_v3 = vld [vmem:[#allocation5 + $0x14] ss:$8 sps:$4 sm:$0xff]   ;;  %v1179_v4 = vld [vmem:[#allocation5 + $0x10] ss:$8 sps:$4 sm:$0xff]  }
  0x5c   :  { %158 = vmatpush1.bf16.msra.mxu0 %v1176_v2  ;;  %v115_v6 = vld [vmem:[#allocation2 + $0x8] sm:$0xff]  ;;  %vm153_vm0 = vcmask 261120   ;;  %v124_v9 = vshrl.u32 %v123_v8, 7  ;;  %v121_v11 = vld [vmem:[%s1689_s2] sm:$0x3]  ;;  %s1450_s29 = smov [#allocation11]  }
  0x5d   :  { %159 = vmatprep.subr.bf16.mxu0 %v1177_v3  ;;  %v116_v7 = vpack.c.bf16 %v115_v6, %v114_v5  ;;  %v1180_v25 = vld [vmem:[#allocation7 + $0x4] ss:$8 sps:$4 sm:$0xff]   ;;  %v1182_v26 = vld [vmem:[#allocation7] ss:$8 sps:$4 sm:$0xff]   ;;  %v1183_v27 = vld [vmem:[#allocation7 + $0x14] ss:$8 sps:$4 sm:$0xff]  }
  0x5e   :  { %v1610_v10 = vsub.s32 0, %v124_v9  ;;  %v1615_v12 = vsub.s32 1, %v124_v9  ;;  %475 = vmatprep.subr.bf16.mxu1 %v1180_v25  ;;  %v1185_v28 = vld [vmem:[#allocation7 + $0x10] ss:$8 sps:$4 sm:$0xff]   ;;  %v1186_v29 = vld [vmem:[#allocation7 + $0x24] ss:$8 sps:$4 sm:$0xff]  }
  0x5f   :  { %476 = vmatpush1.bf16.msra.mxu1 %v1182_v26  ;;  %v1188_v30 = vld [vmem:[#allocation7 + $0x20] ss:$8 sps:$4 sm:$0xff]   ;;  %v1189_v31 = vld [vmem:[#allocation7 + $0x34] ss:$8 sps:$4 sm:$0xff]   ;;  %v1191_v32 = vld [vmem:[#allocation7 + $0x30] ss:$8 sps:$4 sm:$0xff]  }
  0x60   :  { %160 = vmatpush1.bf16.msra.mxu0 %v1179_v4  ;;  %v126_v13 = vrot.slane %v121_v11, %v1610_v10  ;;  %v130_v14 = vrot.slane %v121_v11, %v1615_v12  ;;  %477 = vmatprep.subr.bf16.mxu1 %v1183_v27  ;;  %v1192_v33 = vld [vmem:[#allocation7 + $0x44] ss:$8 sps:$4 sm:$0xff]   ;;  %v1194_v34 = vld [vmem:[#allocation7 + $0x40] ss:$8 sps:$4 sm:$0xff]   ;;  %v1195_v35 = vld [vmem:[#allocation7 + $0x54] ss:$8 sps:$4 sm:$0xff]  }
  0x61   :  { %v1197_v36 = vld [vmem:[#allocation7 + $0x50] ss:$8 sps:$4 sm:$0xff]   ;;  %v1198_v37 = vld [vmem:[#allocation7 + $0x64] ss:$8 sps:$4 sm:$0xff]   ;;  %v1200_v38 = vld [vmem:[#allocation7 + $0x60] ss:$8 sps:$4 sm:$0xff]  }
  0x62   :  { %v1201_v39 = vld [vmem:[#allocation7 + $0x74] ss:$8 sps:$4 sm:$0xff]   ;;  %v1203_v40 = vld [vmem:[#allocation7 + $0x70] ss:$8 sps:$4 sm:$0xff]   ;;  %v1204_v41 = vld [vmem:[#allocation7 + $0x84] ss:$8 sps:$4 sm:$0xff]  }
  0x63   :  { %1050 = vmatmul.mubr.msk.bf16.vlgmr.msra.gmra.mrb[0].mxu0 %vm153_vm0, %v116_v7  ;;  %478 = vmatpush1.bf16.msra.mxu1 %v1185_v28  ;;  %v1206_v42 = vld [vmem:[#allocation7 + $0x80] ss:$8 sps:$4 sm:$0xff]   ;;  %v1207_v57 = vld [vmem:[#allocation7 + $0x94] ss:$8 sps:$4 sm:$0xff]   ;;  %v1209_v58 = vld [vmem:[#allocation7 + $0x90] ss:$8 sps:$4 sm:$0xff]  }
  0x64   :  { %479 = vmatprep.subr.bf16.mxu1 %v1186_v29  ;;  %v1210_v59 = vld [vmem:[#allocation7 + $0xa4] ss:$8 sps:$4 sm:$0xff]   ;;  %v1212_v60 = vld [vmem:[#allocation7 + $0xa0] ss:$8 sps:$4 sm:$0xff]   ;;  %v1213_v61 = vld [vmem:[#allocation7 + $0xb4] ss:$8 sps:$4 sm:$0xff]  }
  0x65   :  { %v1215_v62 = vld [vmem:[#allocation7 + $0xb0] ss:$8 sps:$4 sm:$0xff]   ;;  %v1216_v63 = vld [vmem:[#allocation7 + $0xc4] ss:$8 sps:$4 sm:$0xff]   ;;  %v1218_v0 = vld [vmem:[#allocation7 + $0xc0] ss:$8 sps:$4 sm:$0xff]  }
  0x66   :  { %v1219_v1 = vld [vmem:[#allocation7 + $0xd4] ss:$8 sps:$4 sm:$0xff]   ;;  %v1221_v2 = vld [vmem:[#allocation7 + $0xd0] ss:$8 sps:$4 sm:$0xff]   ;;  %v1222_v3 = vld [vmem:[#allocation7 + $0xe4] ss:$8 sps:$4 sm:$0xff]  }
  0x67   :  { %480 = vmatpush1.bf16.msra.mxu1 %v1188_v30  ;;  %v1224_v4 = vld [vmem:[#allocation7 + $0xe0] ss:$8 sps:$4 sm:$0xff]   ;;  %v1225_v5 = vld [vmem:[#allocation7 + $0xf4] ss:$8 sps:$4 sm:$0xff]   ;;  %v1227_v6 = vld [vmem:[#allocation7 + $0xf0] ss:$8 sps:$4 sm:$0xff]  }
  0x68   :  { %481 = vmatprep.subr.bf16.mxu1 %v1189_v31  ;;  %s1032_s30 = sshll.u32 %s1450_s29, 4  ;;  %s1033_s30 = int_to_ptr.vmem [resolvable:$true] %s1032_s30 }
  0x69   :  { %s1410_s14 = scalar_lea.vmem %s1033_s30, 128  ;;  %p1415_p13 = scmp.lt.s32.totalorder %s1033_s30, %s1033_s30 }
  0x6a   :  { %p1411_p12 = scmp.ne.s32.totalorder %s1033_s30, %s1410_s14  ;;  %p1416_p0 = scmp.lt.s32.totalorder %s1410_s14, %s1410_s14 }
  0x6b   :  { %482 = vmatpush1.bf16.msra.mxu1 %v1191_v32 }
  0x6c   :  { %483 = vmatprep.subr.bf16.mxu1 %v1192_v33  ;;  %p1417_p1 = por %p1416_p0, %p1415_p13 }
  0x6e   :  { %p1418_p2 = pnand %p1417_p1, %p1411_p12 }
  0x6f   :  { %484 = vmatpush1.bf16.msra.mxu1 %v1194_v34 }
  0x70   :  { %485 = vmatprep.subr.bf16.mxu1 %v1195_v35 }
  0x73   :  { %486 = vmatpush1.bf16.msra.mxu1 %v1197_v36 }
  0x74   :  { %487 = vmatprep.subr.bf16.mxu1 %v1198_v37 }
  0x77   :  { %488 = vmatpush1.bf16.msra.mxu1 %v1200_v38 }
  0x78   :  { %489 = vmatprep.subr.bf16.mxu1 %v1201_v39 }
  0x7b   :  { %490 = vmatpush1.bf16.msra.mxu1 %v1203_v40 }
  0x7c   :  { %491 = vmatprep.subr.bf16.mxu1 %v1204_v41  ;;  %v303_v41 = vld [vmem:[%s1693_s6] sm:$0x3] }
  0x7f   :  { %492 = vmatpush1.bf16.msra.mxu1 %v1206_v42  ;;  %v308_v42 = vrot.slane %v303_v41, %v1610_v10 }
  0x80   :  { %493 = vmatprep.subr.bf16.mxu1 %v1207_v57  ;;  %v1231_v57 = vld [vmem:[#allocation8 + $0x10] ss:$8 sps:$4 sm:$0xff]  }
  0x83   :  { %494 = vmatpush1.bf16.msra.mxu1 %v1209_v58  ;;  %v1236_v58 = vld [vmem:[#allocation8 + $0x24] ss:$8 sps:$4 sm:$0xff]  }
  0x84   :  { %495 = vmatprep.subr.bf16.mxu1 %v1210_v59  ;;  %v1234_v59 = vld [vmem:[#allocation8 + $0x20] ss:$8 sps:$4 sm:$0xff]  }
  0x87   :  { %496 = vmatpush1.bf16.msra.mxu1 %v1212_v60  ;;  %v1239_v60 = vld [vmem:[#allocation8 + $0x34] ss:$8 sps:$4 sm:$0xff]  }
  0x88   :  { %497 = vmatprep.subr.bf16.mxu1 %v1213_v61  ;;  %v1237_v61 = vld [vmem:[#allocation8 + $0x30] ss:$8 sps:$4 sm:$0xff]  }
  0x8b   :  { %498 = vmatpush1.bf16.msra.mxu1 %v1215_v62  ;;  %v1242_v62 = vld [vmem:[#allocation8 + $0x44] ss:$8 sps:$4 sm:$0xff]  }
  0x8c   :  { %499 = vmatprep.subr.bf16.mxu1 %v1216_v63  ;;  %v1240_v63 = vld [vmem:[#allocation8 + $0x40] ss:$8 sps:$4 sm:$0xff]  }
  0x8f   :  { %500 = vmatpush1.bf16.msra.mxu1 %v1218_v0  ;;  %v1245_v0 = vld [vmem:[#allocation8 + $0x54] ss:$8 sps:$4 sm:$0xff]  }
  0x90   :  { %501 = vmatprep.subr.bf16.mxu1 %v1219_v1  ;;  %v1243_v1 = vld [vmem:[#allocation8 + $0x50] ss:$8 sps:$4 sm:$0xff]  }
  0x93   :  { %502 = vmatpush1.bf16.msra.mxu1 %v1221_v2  ;;  %v1248_v2 = vld [vmem:[#allocation8 + $0x64] ss:$8 sps:$4 sm:$0xff]  }
  0x94   :  { %503 = vmatprep.subr.bf16.mxu1 %v1222_v3  ;;  %v1246_v3 = vld [vmem:[#allocation8 + $0x60] ss:$8 sps:$4 sm:$0xff]  }
  0x97   :  { %504 = vmatpush1.bf16.msra.mxu1 %v1224_v4  ;;  %v1251_v4 = vld [vmem:[#allocation8 + $0x74] ss:$8 sps:$4 sm:$0xff]  }
  0x98   :  { %505 = vmatprep.subr.bf16.mxu1 %v1225_v5  ;;  %v1249_v5 = vld [vmem:[#allocation8 + $0x70] ss:$8 sps:$4 sm:$0xff]  }
  0x9b   :  { %506 = vmatpush1.bf16.msra.mxu1 %v1227_v6  ;;  %v1254_v6 = vld [vmem:[#allocation8 + $0x84] ss:$8 sps:$4 sm:$0xff]  }
 0x136   :  { %v191_v15 = vpop.f32.mrb[0].mxu0 }
 0x137   :  { %v192_v16 = vadd.f32 %v191_v15, %v126_v13  ;;  %v193_v17 = vpop.f32.mrb[1].mxu0  ;;  %v233_v15 = vld [vmem:[%s1690_s3] sm:$0x3] }
 0x138   :  { %v194_v18 = vadd.f32 %v193_v17, %v130_v14  ;;  %v195_v19 = vpop.f32.mrb[2].mxu0  ;;  %v242_v17 = vrot.slane %v233_v15, %v1615_v12 }
 0x139   :  { %v197_v20 = vpop.f32.mrb[3].mxu0  ;;  %v196_v21 = vadd.f32 %v195_v19, %v126_v13  ;;  %v249_v19 = vld [vmem:[%s1691_s4] sm:$0x3] }
 0x13a   :  { %v198_v22 = vadd.f32 %v197_v20, %v130_v14  ;;  %v200_v23 = vadd.f32 %v194_v18, %v192_v16 }
 0x13c   :  { %201 = vadd.xlane.f32.xlu0 %v200_v23  ;;  %v203_v24 = vadd.f32 %v198_v22, %v196_v21  ;;  %v254_v23 = vrot.slane %v249_v19, %v1610_v10 }
 0x140   :  { %204 = vadd.xlane.f32.xlu0 %v203_v24  ;;  %v258_v24 = vrot.slane %v249_v19, %v1615_v12 }
 0x1c9   :  { %v202_v43 = vpop.xlane.xlu0 %201 }
 0x1ca   :  { %v207_v44 = vmul.f32 0.00390625, %v202_v43  ;;  %v312_v43 = vrot.slane %v303_v41, %v1615_v12  ;;  %v1279_v41 = vld [vmem:[#allocation10 + $0x8] sm:$0xff]  }
 0x1cc   :  { %v209_v45 = vsub.f32 %v192_v16, %v207_v44  ;;  %v210_v46 = vsub.f32 %v194_v18, %v207_v44  ;;  %v238_v16 = vrot.slane %v233_v15, %v1610_v10 }
 0x1cd   :  { %v205_v47 = vpop.xlane.xlu0 %204 }
 0x1ce   :  { %v208_v48 = vmul.f32 0.00390625, %v205_v47  ;;  %v213_v49 = vmul.f32 %v209_v45, %v209_v45  ;;  %v214_v50 = vmul.f32 %v210_v46, %v210_v46 }
 0x1d0   :  { %v211_v51 = vsub.f32 %v196_v21, %v208_v48  ;;  %v212_v52 = vsub.f32 %v198_v22, %v208_v48  ;;  %v217_v53 = vadd.f32 %v214_v50, %v213_v49 }
 0x1d2   :  { %218 = vadd.xlane.f32.xlu1 %v217_v53  ;;  %v215_v54 = vmul.f32 %v211_v51, %v211_v51  ;;  %v216_v55 = vmul.f32 %v212_v52, %v212_v52 }
 0x1d4   :  { %v220_v56 = vadd.f32 %v216_v55, %v215_v54  ;;  %v1228_v54 = vld [vmem:[#allocation8] ss:$8 sps:$4 sm:$0xff]   ;;  %v1230_v55 = vld [vmem:[#allocation8 + $0x4] ss:$8 sps:$4 sm:$0xff]  }
 0x1d5   :  { %792 = vmatprep.subr.bf16.mxu0 %v1230_v55  ;;  %v550_v55 = vld [vmem:[%s1694_s7] sm:$0x3] }
 0x1d6   :  { %221 = vadd.xlane.f32.xlu1 %v220_v56  ;;  %v1233_v56 = vld [vmem:[#allocation8 + $0x14] ss:$8 sps:$4 sm:$0xff]   ;;  %793 = vmatpush1.bf16.msra.mxu0 %v1228_v54 }
 0x1d7   :  { %794 = vmatprep.subr.bf16.mxu0 %v1233_v56  ;;  %v566_v56 = vld [vmem:[%s1695_s8] sm:$0x3] }
 0x1da   :  { %795 = vmatpush1.bf16.msra.mxu0 %v1231_v57  ;;  %v555_v57 = vrot.slane %v550_v55, %v1610_v10 }
 0x1db   :  { %796 = vmatprep.subr.bf16.mxu0 %v1236_v58  ;;  %v559_v58 = vrot.slane %v550_v55, %v1615_v12 }
 0x1de   :  { %797 = vmatpush1.bf16.msra.mxu0 %v1234_v59 }
 0x1df   :  { %798 = vmatprep.subr.bf16.mxu0 %v1239_v60 }
 0x1e2   :  { %799 = vmatpush1.bf16.msra.mxu0 %v1237_v61 }
 0x1e3   :  { %800 = vmatprep.subr.bf16.mxu0 %v1242_v62  ;;  %v571_v62 = vrot.slane %v566_v56, %v1610_v10 }
 0x1e6   :  { %801 = vmatpush1.bf16.msra.mxu0 %v1240_v63  ;;  %v575_v63 = vrot.slane %v566_v56, %v1615_v12 }
 0x1e7   :  { %802 = vmatprep.subr.bf16.mxu0 %v1245_v0 }
 0x1ea   :  { %803 = vmatpush1.bf16.msra.mxu0 %v1243_v1 }
 0x1eb   :  { %804 = vmatprep.subr.bf16.mxu0 %v1248_v2 }
 0x1ee   :  { %805 = vmatpush1.bf16.msra.mxu0 %v1246_v3 }
 0x1ef   :  { %806 = vmatprep.subr.bf16.mxu0 %v1251_v4 }
 0x1f2   :  { %807 = vmatpush1.bf16.msra.mxu0 %v1249_v5 }
 0x1f3   :  { %808 = vmatprep.subr.bf16.mxu0 %v1254_v6 }
 0x25f   :  { %v219_v7 = vpop.xlane.xlu1 %218 }
 0x260   :  { %v223_v8 = vmul.f32 0.00390625, %v219_v7  ;;  %v1252_v7 = vld [vmem:[#allocation8 + $0x80] ss:$8 sps:$4 sm:$0xff]  }
 0x261   :  { %809 = vmatpush1.bf16.msra.mxu0 %v1252_v7 }
 0x262   :  { %v225_v9 = vadd.f32 1e-05, %v223_v8 }
 0x263   :  { %v222_v11 = vpop.xlane.xlu1 %221 }
 0x264   :  { %1292 = vrsqrt.f32 %v225_v9  ;;  %v224_v13 = vmul.f32 0.00390625, %v222_v11 }
 0x266   :  { %v226_v14 = vadd.f32 1e-05, %v224_v13 }
 0x268   :  { %1294 = vrsqrt.f32 %v226_v14 }
 0x26e   :  { %v1293_v18 = vpop.eup %1292 }
 0x26f   :  { %v230_v20 = vmul.f32 %v1293_v18, %v210_v46  ;;  %v229_v21 = vmul.f32 %v1293_v18, %v209_v45 }
 0x271   :  { %v246_v22 = vmul.f32 %v242_v17, %v230_v20  ;;  %v245_v25 = vmul.f32 %v238_v16, %v229_v21 }
 0x272   :  { %v1295_v26 = vpop.eup %1294 }
 0x273   :  { %v232_v27 = vmul.f32 %v1295_v26, %v212_v52  ;;  %v231_v28 = vmul.f32 %v1295_v26, %v211_v51  ;;  %v262_v30 = vadd.f32 %v258_v24, %v246_v22  ;;  %v261_v32 = vadd.f32 %v254_v23, %v245_v25  ;;  %v1255_v25 = vld [vmem:[#allocation8 + $0x90] ss:$8 sps:$4 sm:$0xff]   ;;  %v1260_v26 = vld [vmem:[#allocation8 + $0xa4] ss:$8 sps:$4 sm:$0xff]  }
 0x275   :  { %v248_v29 = vmul.f32 %v242_v17, %v232_v27  ;;  %v247_v31 = vmul.f32 %v238_v16, %v231_v28  ;;  %v266_v35 = vmax.f32 %v262_v30, 0.0  ;;  %v265_v37 = vmax.f32 %v261_v32, 0.0  ;;  %v1258_v27 = vld [vmem:[#allocation8 + $0xa0] ss:$8 sps:$4 sm:$0xff]   ;;  %v1263_v28 = vld [vmem:[#allocation8 + $0xb4] ss:$8 sps:$4 sm:$0xff]  }
 0x276   :  { %v1266_v30 = vld [vmem:[#allocation8 + $0xc4] ss:$8 sps:$4 sm:$0xff]   ;;  %v1269_v32 = vld [vmem:[#allocation8 + $0xd4] ss:$8 sps:$4 sm:$0xff]  }
 0x277   :  { %v264_v33 = vadd.f32 %v258_v24, %v248_v29  ;;  %v263_v34 = vadd.f32 %v254_v23, %v247_v31  ;;  %v1257_v24 = vld [vmem:[#allocation8 + $0x94] ss:$8 sps:$4 sm:$0xff]   ;;  %v1261_v29 = vld [vmem:[#allocation8 + $0xb0] ss:$8 sps:$4 sm:$0xff]   ;;  %v1264_v31 = vld [vmem:[#allocation8 + $0xc0] ss:$8 sps:$4 sm:$0xff]  }
 0x278   :  { %810 = vmatprep.subr.bf16.mxu0 %v1257_v24  ;;  %v620_v24 = vld [vmem:[%s1697_s10] sm:$0x3] }
 0x279   :  { %v268_v36 = vmax.f32 %v264_v33, 0.0  ;;  %v267_v38 = vmax.f32 %v263_v34, 0.0  ;;  %811 = vmatpush1.bf16.msra.mxu0 %v1255_v25  ;;  %v1267_v33 = vld [vmem:[#allocation8 + $0xd0] ss:$8 sps:$4 sm:$0xff]   ;;  %v1270_v34 = vld [vmem:[#allocation8 + $0xe0] ss:$8 sps:$4 sm:$0xff]   ;;  %v625_v25 = vrot.slane %v620_v24, %v1610_v10 }
 0x27a   :  { %812 = vmatprep.subr.bf16.mxu0 %v1260_v26  ;;  %v629_v26 = vrot.slane %v620_v24, %v1615_v12 }
 0x27b   :  { %v270_v39 = vpack.c.bf16 %v268_v36, %v266_v35  ;;  %v269_v40 = vpack.c.bf16 %v267_v38, %v265_v37  ;;  %v1272_v35 = vld [vmem:[#allocation8 + $0xe4] ss:$8 sps:$4 sm:$0xff]   ;;  %v1275_v36 = vld [vmem:[#allocation8 + $0xf4] ss:$8 sps:$4 sm:$0xff]   ;;  %v1273_v37 = vld [vmem:[#allocation8 + $0xf0] ss:$8 sps:$4 sm:$0xff]  }
 0x27c   :  { %v1276_v38 = vld [vmem:[#allocation10 + $0x40] sm:$0xff]  }
 0x27d   :  { %507 = vmatprep.mubr.bf16.mxu1 %v270_v39  ;;  %813 = vmatpush1.bf16.msra.mxu0 %v1258_v27  ;;  %v1277_v39 = vld [vmem:[#allocation10] sm:$0xff]  }
 0x27e   :  { %508 = vmatmul.mubr.bf16.vlgmr.msra.gmra.mrb[0].mxu1 %v269_v40  ;;  %814 = vmatprep.subr.bf16.mxu0 %v1263_v28  ;;  %v1278_v40 = vld [vmem:[#allocation10 + $0x48] sm:$0xff]  }
 0x27f   :  { %1141 = vmatprep.subr.bf16.mxu1 %v1276_v38 }
 0x280   :  { %1142 = vmatpush3.bf16.msra.mxu1 %v1277_v39 }
 0x281   :  { %815 = vmatpush1.bf16.msra.mxu0 %v1261_v29  ;;  %1143 = vmatprep.subr.bf16.mxu1 %v1278_v40 }
 0x282   :  { %816 = vmatprep.subr.bf16.mxu0 %v1266_v30 }
 0x284   :  { %1144 = vmatpush3.bf16.msra.mxu1 %v1279_v41 }
 0x285   :  { %817 = vmatpush1.bf16.msra.mxu0 %v1264_v31 }
 0x286   :  { %818 = vmatprep.subr.bf16.mxu0 %v1269_v32 }
 0x289   :  { %819 = vmatpush1.bf16.msra.mxu0 %v1267_v33 }
 0x28a   :  { %820 = vmatprep.subr.bf16.mxu0 %v1272_v35 }
 0x28d   :  { %821 = vmatpush1.bf16.msra.mxu0 %v1270_v34 }
 0x28e   :  { %822 = vmatprep.subr.bf16.mxu0 %v1275_v36 }
 0x291   :  { %823 = vmatpush1.bf16.msra.mxu0 %v1273_v37 }
 0x351   :  { %v509_v44 = vpop.f32.mrb[0].mxu1 }
 0x352   :  { %v510_v45 = vadd.f32 %v509_v44, %v308_v42  ;;  %v511_v46 = vpop.f32.mrb[1].mxu1  ;;  %v1282_v44 = vld [vmem:[#allocation10 + $0x58] sm:$0xff]  }
 0x353   :  { %v512_v47 = vadd.f32 %v511_v46, %v312_v43  ;;  %v513_v48 = vpop.f32.mrb[2].mxu1  ;;  %v1284_v46 = vld [vmem:[#allocation10 + $0x60] sm:$0xff]  }
 0x354   :  { %v514_v49 = vadd.f32 %v513_v48, %v308_v42  ;;  %v515_v50 = vpop.f32.mrb[3].mxu1  ;;  %v1280_v42 = vld [vmem:[#allocation10 + $0x50] sm:$0xff]   ;;  %v1286_v48 = vld [vmem:[#allocation10 + $0x68] sm:$0xff]  }
 0x355   :  { %v516_v51 = vadd.f32 %v515_v50, %v312_v43  ;;  %v518_v52 = vadd.f32 %v512_v47, %v510_v45  ;;  %v1281_v43 = vld [vmem:[#allocation10 + $0x10] sm:$0xff]   ;;  %1145 = vmatprep.subr.bf16.mxu1 %v1280_v42 }
 0x356   :  { %1146 = vmatpush3.bf16.msra.mxu1 %v1281_v43  ;;  %v1115_v43 = vld [vmem:[%s1699_s12] ss:$0 sm:$0xff] }
 0x357   :  { %519 = vadd.xlane.f32.xlu0 %v518_v52  ;;  %v521_v53 = vadd.f32 %v516_v51, %v514_v49  ;;  %1147 = vmatprep.subr.bf16.mxu1 %v1282_v44 }
 0x359   :  { %522 = vadd.xlane.f32.xlu1 %v521_v53 }
 0x3e4   :  { %v520_v8 = vpop.xlane.xlu0 %519 }
 0x3e5   :  { %v524_v9 = vmul.f32 0.00390625, %v520_v8 }
 0x3e6   :  { %v523_v11 = vpop.xlane.xlu1 %522 }
 0x3e7   :  { %v1634_v13 = vsub.f32 %v510_v45, %v524_v9  ;;  %v1636_v14 = vsub.f32 %v512_v47, %v524_v9  ;;  %v525_v15 = vmul.f32 0.00390625, %v523_v11  ;;  %v1283_v45 = vld [vmem:[#allocation10 + $0x18] sm:$0xff]   ;;  %v1285_v47 = vld [vmem:[#allocation10 + $0x20] sm:$0xff]  }
 0x3e8   :  { %1148 = vmatpush3.bf16.msra.mxu1 %v1283_v45 }
 0x3e9   :  { %v1638_v16 = vsub.f32 %v514_v49, %v525_v15  ;;  %v1640_v17 = vsub.f32 %v516_v51, %v525_v15  ;;  %v530_v18 = vmul.f32 %v1634_v13, %v1634_v13  ;;  %v531_v19 = vmul.f32 %v1636_v14, %v1636_v14  ;;  %1149 = vmatprep.subr.bf16.mxu1 %v1284_v46 }
 0x3eb   :  { %v534_v20 = vadd.f32 %v531_v19, %v530_v18  ;;  %v532_v21 = vmul.f32 %v1638_v16, %v1638_v16  ;;  %v533_v22 = vmul.f32 %v1640_v17, %v1640_v17 }
 0x3ec   :  { %1150 = vmatpush3.bf16.msra.mxu1 %v1285_v47 }
 0x3ed   :  { %535 = vadd.xlane.f32.xlu0 %v534_v20  ;;  %v537_v23 = vadd.f32 %v533_v22, %v532_v21  ;;  %1151 = vmatprep.subr.bf16.mxu1 %v1286_v48  ;;  %v1287_v21 = vld [vmem:[#allocation10 + $0x28] sm:$0xff]   ;;  %v1290_v22 = vld [vmem:[#allocation10 + $0x78] sm:$0xff]  }
 0x3ef   :  { %538 = vadd.xlane.f32.xlu1 %v537_v23  ;;  %v1291_v23 = vld [vmem:[#allocation10 + $0x38] sm:$0xff]  }
 0x3f0   :  { %1152 = vmatpush3.bf16.msra.mxu1 %v1287_v21 }
 0x47a   :  { %v536_v49 = vpop.xlane.xlu0 %535 }
 0x47b   :  { %v540_v50 = vmul.f32 0.00390625, %v536_v49 }
 0x47c   :  { %v539_v51 = vpop.xlane.xlu1 %538 }
 0x47d   :  { %v542_v52 = vadd.f32 1e-05, %v540_v50  ;;  %v541_v53 = vmul.f32 0.00390625, %v539_v51 }
 0x47f   :  { %1296 = vrsqrt.f32 %v542_v52  ;;  %v543_v54 = vadd.f32 1e-05, %v541_v53 }
 0x481   :  { %1298 = vrsqrt.f32 %v543_v54 }
 0x489   :  { %v1297_v59 = vpop.eup %1296 }
 0x48a   :  { %v546_v60 = vmul.f32 %v1297_v59, %v1634_v13  ;;  %v547_v61 = vmul.f32 %v1297_v59, %v1636_v14 }
 0x48b   :  { %v1299_v0 = vpop.eup %1298 }
 0x48c   :  { %v548_v1 = vmul.f32 %v1299_v0, %v1638_v16  ;;  %v549_v2 = vmul.f32 %v1299_v0, %v1640_v17  ;;  %v563_v3 = vmul.f32 %v559_v58, %v547_v61  ;;  %v562_v4 = vmul.f32 %v555_v57, %v546_v60  ;;  %v1288_v16 = vld [vmem:[#allocation10 + $0x70] sm:$0xff]  }
 0x48d   :  { %v1289_v17 = vld [vmem:[#allocation10 + $0x30] sm:$0xff]   ;;  %1153 = vmatprep.subr.bf16.mxu1 %v1288_v16 }
 0x48e   :  { %v565_v5 = vmul.f32 %v559_v58, %v549_v2  ;;  %v579_v6 = vadd.f32 %v575_v63, %v563_v3  ;;  %v564_v7 = vmul.f32 %v555_v57, %v548_v1  ;;  %v578_v8 = vadd.f32 %v571_v62, %v562_v4  ;;  %1154 = vmatpush3.bf16.msra.mxu1 %v1289_v17 }
 0x48f   :  { %1155 = vmatprep.subr.bf16.mxu1 %v1290_v22 }
 0x490   :  { %v581_v9 = vadd.f32 %v575_v63, %v565_v5  ;;  %v580_v11 = vadd.f32 %v571_v62, %v564_v7  ;;  %v583_v13 = vmax.f32 %v579_v6, 0.0  ;;  %v582_v14 = vmax.f32 %v578_v8, 0.0 }
 0x492   :  { %v585_v15 = vmax.f32 %v581_v9, 0.0  ;;  %v584_v18 = vmax.f32 %v580_v11, 0.0  ;;  %1156 = vmatpush3.bf16.msra.mxu1 %v1291_v23 }
 0x494   :  { %v587_v19 = vpack.c.bf16 %v585_v15, %v583_v13  ;;  %v586_v20 = vpack.c.bf16 %v584_v18, %v582_v14 }
 0x496   :  { %824 = vmatprep.mubr.bf16.mxu0 %v587_v19 }
 0x497   :  { %825 = vmatmul.mubr.bf16.vlgmr.msra.gmra.mrb[4].mxu0 %v586_v20 }
 0x56a   :  { %v826_v27 = vpop.f32.mrb[4].mxu0 }
 0x56b   :  { %v827_v28 = vadd.f32 %v826_v27, %v625_v25  ;;  %v828_v29 = vpop.f32.mrb[5].mxu0 }
 0x56c   :  { %v829_v30 = vadd.f32 %v828_v29, %v629_v26  ;;  %v830_v31 = vpop.f32.mrb[6].mxu0 }
 0x56d   :  { %v831_v32 = vadd.f32 %v830_v31, %v625_v25  ;;  %v832_v33 = vpop.f32.mrb[7].mxu0  ;;  %v835_v35 = vmax.f32 %v827_v28, 0.0 }
 0x56e   :  { %v833_v34 = vadd.f32 %v832_v33, %v629_v26  ;;  %v836_v37 = vmax.f32 %v829_v30, 0.0 }
 0x56f   :  { %v837_v36 = vmax.f32 %v831_v32, 0.0 }
 0x570   :  { %v838_v38 = vmax.f32 %v833_v34, 0.0 }
 0x571   :  { %v839_v39 = vpack.c.bf16 %v837_v36, %v835_v35 }
 0x572   :  { %v840_v40 = vpack.c.bf16 %v838_v38, %v836_v37 }
 0x574   :  { %1008 = vmatprep.mubr.bf16.mxu1 %v840_v40 }
 0x575   :  { %1009 = vmatmul.mubr.bf16.vlgmr.msra.gmra.mrb[4].mxu1 %v839_v39 }
 0x648   :  { %v1157_v41 = vpop.f32.mrb[4].mxu1 }
 0x649   :  { %v1158_v10 = vpop.f32.mrb[5].mxu1 }
 0x64a   :  { %v1159_v42 = vadd.f32 %v1158_v10, %v1157_v41  ;;  %v1160_v12 = vpop.f32.mrb[6].mxu1 }
 0x64b   :  { %v1161_v44 = vpop.f32.mrb[7].mxu1 }
 0x64c   :  { %v1162_v45 = vadd.f32 %v1161_v44, %v1160_v12  ;;  %v1011_v46 = vadd.f32 %v1159_v42, %v1115_v43 }
 0x64e   :  { %v1014_v47 = vadd.f32 %v1162_v45, %v1115_v43 }
 0x650   :  { %v1139_v48 = vpack.c.bf16 %v1014_v47, %v1011_v46 }
 0x652   :  { %1140 = vst [vmem:[#allocation11] sm:$0xff] %v1139_v48  }
 0x653   :  { %1421 = shalt.err (!%p1418_p2)
}
 0x654   :  { %s1422_s12 = scalar_lea.hbm %s1700_s13, 128 }
 0x655   :  { %p1423_p3 = scmp.ne.s32.totalorder %s1700_s13, %s1422_s12  ;;  %p1426_p4 = scmp.lt.u32.totalorder %s1422_s12, %s1700_s13 }
 0x657   :  { %p1428_p5 = pnand %p1426_p4, %p1423_p3 }
 0x659   :  { %1431 = shalt.err (!%p1428_p5)
}
 0x65a   :  { %1038 = dma.vmem_to_hbm [thread:$0]  %s1033_s30, 128, %s1700_s13, [#allocation4], %s1447_s5, %s1447_s5, %s1448_s20  }
 0x65b   :  { %1438 = dma.done.wait [#allocation4], 128  }
 0x65c   :  { %1439 = vsyncadd [#allocation4], 4294967168 }
 0x65d   :  { %1042 = vsyncpa [#allocation3], 1 }
 0x65e   :  { %1043 = vsyncpa [#allocation6], 1 }
 0x65f   :  { %1044 = vsyncpa [#allocation9], 1 }
 0x660   :  { %1045 = vsyncpa [#allocation4], 1 }

</bundles_post_ra>
